<compile_context>
chip_gen: v5e
topology: v5e:2x2
jax: 0.10.0
libtpu: 0.0.40
codegen_flags: <defaults>
</compile_context>

<pallas_src>
import jax
import jax.numpy as jnp
from jax import lax
from jax.experimental import pallas as pl
from jax.experimental.pallas import tpu as pltpu

EPS = 1e-5  # nn.LayerNorm default


def _make_kernel(affine):
    """Fused LayerNorm -> dropout(0) -> +residual kernel body."""

    def kernel(*refs):
        if affine:
            x_ref, res_ref, gamma_ref, beta_ref, o_ref = refs
        else:
            x_ref, res_ref, o_ref = refs

        # 'n' : LayerNorm over the last (lane) dim, computed in f32.
        #       Two-pass (x - mean) form kept for numerical safety.
        x = x_ref[...].astype(jnp.float32)
        mean = jnp.mean(x, axis=-1, keepdims=True)
        xc = x - mean
        var = jnp.mean(xc * xc, axis=-1, keepdims=True)
        y = xc * lax.rsqrt(var + EPS)
        if affine:
            y = y * gamma_ref[...].astype(jnp.float32) \
                + beta_ref[...].astype(jnp.float32)

        # 'd' : dropout(p=0.0) -> identity in eval mode.
        # TODO(synk): for p>0 training mode, draw a keep-mask with
        #             pltpu.prng_seed / pltpu.stateful_bernoulli and scale by 1/(1-p).

        # 'a' : residual add (gated_residuals=False).
        o_ref[...] = (y + res_ref[...].astype(jnp.float32)).astype(o_ref.dtype)

    return kernel


def _round_up(x, m):
    return ((x + m - 1) // m) * m


def _vmem_capacity_bytes():
    """Trace-time VMEM capacity query with a conservative (v7x) fallback."""
    try:
        return int(pltpu.get_tpu_info().vmem_capacity_bytes)
    except Exception:
        return 64 << 20


def _choose_tile_rows(rows, d, itemsize, sublane, target_block_bytes):
    """Largest sublane-aligned row tile hitting ~target bytes per block,
    but small enough that the grid has >= ~4 steps (pipeline overlap + 2-TC
    sharding on v7x)."""
    per_row = max(1, d * itemsize)
    tr = max(sublane, (target_block_bytes // per_row) // sublane * sublane)
    tr = min(tr, 2048)                       # diminishing returns past ~1-4 MiB blocks
    min_steps = 4
    tr = min(tr, max(sublane, _round_up((rows + min_steps - 1) // min_steps, sublane)))
    return max(tr, sublane)


def _row_spec(tile_rows, d, buffers=2):
    """Row-tiled BlockSpec; optionally request deeper input pipelining."""
    index_map = lambda i: (i, 0)
    if buffers > 2 and hasattr(pl, "Buffered"):
        try:
            return pl.BlockSpec((tile_rows, d), index_map,
                                pipeline_mode=pl.Buffered(buffers))
        except TypeError:
            pass  # older API without pipeline_mode -> default double buffer
    return pl.BlockSpec((tile_rows, d), index_map)


def prepost_processing(tensor, input_tensor, gamma=None, beta=None, *, tile_rows=None):
    """LayerNorm -> Dropout(0.0) -> +residual, like PrePostProcessing('nda').

    gamma/beta may be None to specialize away the (identity-initialized) affine.
    """
    orig_shape = tensor.shape
    d = orig_shape[-1]
    dtype = tensor.dtype
    itemsize = jnp.dtype(dtype).itemsize
    sublane = {4: 8, 2: 16, 1: 32}.get(itemsize, 8)   # sublane packing per dtype

    x2 = tensor.reshape(-1, d)
    r2 = input_tensor.reshape(-1, d)
    rows = x2.shape[0]

    # Generation-aware sizing: ~75% of this chip's VMEM as the scoped budget,
    # block target derived from it (≈3 MiB on v7x, 4 MiB on v5e/v6e).
    vmem_cap = _vmem_capacity_bytes()
    vmem_budget = int(0.75 * vmem_cap)
    target_block_bytes = min(4 << 20, max(1 << 20, vmem_budget // 16))

    if tile_rows is None:
        tile_rows = _choose_tile_rows(rows, d, itemsize, sublane, target_block_bytes)
    tile_rows = max(sublane, _round_up(tile_rows, sublane))

    grid_steps = pl.cdiv(rows, tile_rows)
    # Deeper input buffering only once there are enough steps to pipeline;
    # output stays at the default double buffer.
    in_buffers = 3 if grid_steps >= 4 else 2

    affine = gamma is not None and beta is not None
    kernel = _make_kernel(affine)

    in_spec = _row_spec(tile_rows, d, in_buffers)
    out_spec = _row_spec(tile_rows, d, 2)
    in_specs = [in_spec, in_spec]
    operands = [x2, r2]
    if affine:
        # Keep the (tiny) param streams in the same dtype as the data streams.
        g2 = gamma.reshape(1, d).astype(dtype)
        b2 = beta.reshape(1, d).astype(dtype)
        param_spec = pl.BlockSpec((1, d), lambda i: (0, 0))
        in_specs += [param_spec, param_spec]
        operands += [g2, b2]

    # Scoped-VMEM budget from the chosen blocks, clamped to the chip budget.
    block_bytes = tile_rows * d * itemsize
    vmem_limit = (2 * in_buffers + 2) * block_bytes   # x / residual / out buffers
    vmem_limit += 6 * tile_rows * d * 4               # f32 temps incl. broadcast gamma/beta
    vmem_limit += 4 * d * 4                           # gamma/beta tiles
    vmem_limit += 2 << 20                             # slack (descriptors, compiler scratch)
    vmem_limit = max(8 << 20, min(vmem_limit, vmem_budget))

    out = pl.pallas_call(
        kernel,
        out_shape=jax.ShapeDtypeStruct((rows, d), dtype),
        grid_spec=pltpu.PrefetchScalarGridSpec(
            num_scalar_prefetch=0,
            grid=(grid_steps,),
            in_specs=in_specs,
            out_specs=out_spec,
        ),
        compiler_params=pltpu.CompilerParams(
            dimension_semantics=("parallel",),   # shards the row grid across both TCs on v7x
            vmem_limit_bytes=int(vmem_limit),
        ),
    )(*operands)

    return out.reshape(orig_shape)


def _reference(tensor, input_tensor, gamma, beta):
    x = tensor.astype(jnp.float32)
    mean = jnp.mean(x, axis=-1, keepdims=True)
    var = jnp.mean((x - mean) ** 2, axis=-1, keepdims=True)
    y = (x - mean) * lax.rsqrt(var + EPS)
    y = y * gamma + beta
    return (y + input_tensor.astype(jnp.float32)).astype(tensor.dtype)


if __name__ == "__main__":
    key = jax.random.PRNGKey(0)
    k1, k2, k3, k4, k5, k6 = jax.random.split(key, 6)

    # --- Test 1: module-default shapes, with the (identity-init) affine params.
    batch, seq, model_dim = 2, 8, 32
    t1 = jax.random.normal(k1, (batch, seq, model_dim), dtype=jnp.float32)
    r1 = jax.random.normal(k2, (batch, seq, model_dim), dtype=jnp.float32)
    g1 = jnp.ones((model_dim,), dtype=jnp.float32)   # nn.LayerNorm default init
    b1 = jnp.zeros((model_dim,), dtype=jnp.float32)
    out1 = jax.block_until_ready(prepost_processing(t1, r1, g1, b1))
    ref1 = _reference(t1, r1, g1, b1)
    assert out1.shape == t1.shape
    assert jnp.allclose(out1, ref1, atol=1e-5, rtol=1e-5), "mismatch (affine)"

    # --- Test 2: non-divisible row count (15) + lane-dense d=128, affine specialized
    # away (gamma=1, beta=0 -> identical math, two fewer input streams). Exercises the
    # in-kernel boundary-block path (no wrapper pad / output slice).
    t2 = jax.random.normal(k3, (3, 5, 128), dtype=jnp.float32)
    r2 = jax.random.normal(k4, (3, 5, 128), dtype=jnp.float32)
    out2 = jax.block_until_ready(prepost_processing(t2, r2))
    ref2 = _reference(t2, r2, jnp.ones((128,), jnp.float32), jnp.zeros((128,), jnp.float32))
    assert out2.shape == t2.shape
    assert jnp.allclose(out2, ref2, atol=1e-5, rtol=1e-5), "mismatch (no-affine, boundary)"

    # --- Test 3: bf16 streams (half the HBM traffic), non-multiple-of-128 d, boundary
    # rows, and enough grid steps to exercise the deeper input-buffering path.
    t3 = jax.random.normal(k5, (3, 85, 48), dtype=jnp.float32).astype(jnp.bfloat16)
    r3 = jax.random.normal(k6, (3, 85, 48), dtype=jnp.float32).astype(jnp.bfloat16)
    g3 = jnp.ones((48,), dtype=jnp.bfloat16)
    b3 = jnp.zeros((48,), dtype=jnp.bfloat16)
    out3 = jax.block_until_ready(prepost_processing(t3, r3, g3, b3))
    ref3 = _reference(t3, r3, g3.astype(jnp.float32), b3.astype(jnp.float32))
    assert out3.shape == t3.shape
    assert jnp.allclose(out3.astype(jnp.float32), ref3.astype(jnp.float32),
                        atol=8e-2, rtol=5e-2), "mismatch (bf16, boundary, deep-buffer)"

    print("KERNEL_OK")
</pallas_src>

<mosaic_0001>
module attributes {stable_mosaic.version = 11 : i64} {
  func.func @kernel(%arg0: i32, %arg1: memref<8x32xf32, #tpu.memory_space<vmem>>, %arg2: memref<8x32xf32, #tpu.memory_space<vmem>>, %arg3: memref<1x32xf32, #tpu.memory_space<vmem>>, %arg4: memref<1x32xf32, #tpu.memory_space<vmem>>, %arg5: memref<8x32xf32, #tpu.memory_space<vmem>>) attributes {dimension_semantics = [#tpu.dimension_semantics<parallel>], iteration_bounds = array<i64: 2>, scalar_prefetch = 0 : i64, scratch_operands = 0 : i64, tpu.core_type = #tpu.core_type<tc>, window_params = [{transform_indices = @transform_0, window_bounds = array<i64: 8, 32>}, {transform_indices = @transform_1, window_bounds = array<i64: 8, 32>}, {pipeline_mode = #tpu.pipeline_mode<synchronous>, transform_indices = @transform_2, window_bounds = array<i64: 1, 32>}, {pipeline_mode = #tpu.pipeline_mode<synchronous>, transform_indices = @transform_3, window_bounds = array<i64: 1, 32>}, {transform_indices = @transform_4, window_bounds = array<i64: 8, 32>}]} {
    %c0 = arith.constant 0 : index
    %c0_0 = arith.constant 0 : index
    %0 = vector.load %arg1[%c0, %c0_0] : memref<8x32xf32, #tpu.memory_space<vmem>>, vector<8x32xf32>
    %cst = arith.constant dense<0.000000e+00> : vector<8xf32>
    %1 = vector.multi_reduction <add>, %0, %cst [1] : vector<8x32xf32> to vector<8xf32>
    %2 = vector.shape_cast %1 : vector<8xf32> to vector<8x1xf32>
    %cst_1 = arith.constant 3.200000e+01 : f32
    %3 = vector.broadcast %cst_1 : f32 to vector<8x1xf32>
    %4 = arith.divf %2, %3 : vector<8x1xf32>
    %5 = vector.broadcast %4 : vector<8x1xf32> to vector<8x32xf32>
    %6 = arith.subf %0, %5 : vector<8x32xf32>
    %7 = arith.mulf %6, %6 : vector<8x32xf32>
    %cst_2 = arith.constant dense<0.000000e+00> : vector<8xf32>
    %8 = vector.multi_reduction <add>, %7, %cst_2 [1] : vector<8x32xf32> to vector<8xf32>
    %9 = vector.shape_cast %8 : vector<8xf32> to vector<8x1xf32>
    %cst_3 = arith.constant 3.200000e+01 : f32
    %10 = vector.broadcast %cst_3 : f32 to vector<8x1xf32>
    %11 = arith.divf %9, %10 : vector<8x1xf32>
    %cst_4 = arith.constant 9.99999974E-6 : f32
    %12 = vector.broadcast %cst_4 : f32 to vector<8x1xf32>
    %13 = arith.addf %11, %12 : vector<8x1xf32>
    %14 = math.rsqrt %13 : vector<8x1xf32>
    %15 = vector.broadcast %14 : vector<8x1xf32> to vector<8x32xf32>
    %16 = arith.mulf %6, %15 : vector<8x32xf32>
    %c0_5 = arith.constant 0 : index
    %c0_6 = arith.constant 0 : index
    %17 = vector.load %arg3[%c0_5, %c0_6] : memref<1x32xf32, #tpu.memory_space<vmem>>, vector<1x32xf32>
    %18 = vector.broadcast %17 : vector<1x32xf32> to vector<8x32xf32>
    %19 = arith.mulf %16, %18 : vector<8x32xf32>
    %c0_7 = arith.constant 0 : index
    %c0_8 = arith.constant 0 : index
    %20 = vector.load %arg4[%c0_7, %c0_8] : memref<1x32xf32, #tpu.memory_space<vmem>>, vector<1x32xf32>
    %21 = vector.broadcast %20 : vector<1x32xf32> to vector<8x32xf32>
    %22 = arith.addf %19, %21 : vector<8x32xf32>
    %c0_9 = arith.constant 0 : index
    %c0_10 = arith.constant 0 : index
    %23 = vector.load %arg2[%c0_9, %c0_10] : memref<8x32xf32, #tpu.memory_space<vmem>>, vector<8x32xf32>
    %24 = arith.addf %22, %23 : vector<8x32xf32>
    %c0_11 = arith.constant 0 : index
    %c0_12 = arith.constant 0 : index
    %25 = vector.load %arg5[%c0_11, %c0_12] : memref<8x32xf32, #tpu.memory_space<vmem>>, vector<8x32xf32>
    tpu.vector_store %arg5[%c0_11, %c0_12], %24 {strides = array<i32>} : memref<8x32xf32, #tpu.memory_space<vmem>>, vector<8x32xf32>,
    return
  }
  func.func @transform_0(%arg0: i32) -> (i32, i32) {
    %c0_i32 = arith.constant 0 : i32
    %c0_i32_0 = arith.constant 0 : i32
    return %arg0, %c0_i32 : i32, i32
  }
  func.func @transform_1(%arg0: i32) -> (i32, i32) {
    %c0_i32 = arith.constant 0 : i32
    %c0_i32_0 = arith.constant 0 : i32
    return %arg0, %c0_i32 : i32, i32
  }
  func.func @transform_2(%arg0: i32) -> (i32, i32) {
    %c0_i32 = arith.constant 0 : i32
    %c0_i32_0 = arith.constant 0 : i32
    %c0_i32_1 = arith.constant 0 : i32
    return %c0_i32, %c0_i32_0 : i32, i32
  }
  func.func @transform_3(%arg0: i32) -> (i32, i32) {
    %c0_i32 = arith.constant 0 : i32
    %c0_i32_0 = arith.constant 0 : i32
    %c0_i32_1 = arith.constant 0 : i32
    return %c0_i32, %c0_i32_0 : i32, i32
  }
  func.func @transform_4(%arg0: i32) -> (i32, i32) {
    %c0_i32 = arith.constant 0 : i32
    %c0_i32_0 = arith.constant 0 : i32
    return %arg0, %c0_i32 : i32, i32
  }
}

</mosaic_0001>

<bundles_post_ra>
// kernel: tpu_custom_call.1
= control target key start
LH: loop header
LB: loop body
LE: loop exit
PB: predicated region body
PF: predicated region fallthrough
CT: control target
= control target key end

     0   :  { %s814_s0 = inlined_call_operand.hbm [shape: f32[16,32], index: 0, kind: input, shape index: {}]   ;;  %s815_s1 = inlined_call_operand.hbm [shape: f32[16,32], index: 1, kind: input, shape index: {}]   ;;  %s816_s2 = inlined_call_operand.vmem [shape: f32[1,32], index: 2, kind: input, shape index: {}]   ;;  %s817_s3 = inlined_call_operand.vmem [shape: f32[1,32], index: 3, kind: input, shape index: {}]   ;;  %s818_s4 = inlined_call_operand.hbm [shape: f32[16,32], index: 4, kind: output, shape index: {}]  }
   0x1   :  { %819 = sst [smem:[#allocation11_spill]] %s814_s0 }
   0x2   :  { %9 = vsyncpa [#allocation3], 0 }
   0x3   :  { %11 = vsyncpa [#allocation3 + $0x1], 0 }
   0x4   :  { %12 = vsyncpa [#allocation6], 0 }
   0x5   :  { %14 = vsyncpa [#allocation6 + $0x1], 0 }
   0x6   :  { %15 = vsyncpa [#allocation4], 0 }
   0x7   :  { %17 = vsyncpa [#allocation4 + $0x1], 0  ;;  %s638_s15 = smov 0   ;;  %s640_s16 = smov 0  }
   0x8   :  { %s642_s17 = smov 0   ;;  %s644_s18 = smov 0  }
   0x9 LB: > { %s659_s19 = sadd.s32 4294967295, %s610_s18   ;;  %s407_s20 = sadd.s32 4294967294, %s610_s18   ;;  %s610_s18 = sphi %s644_s18, %s831_s18   ;;  %s606_s17 = sphi %s642_s17, %s830_s17   ;;  %s602_s16 = sphi %s640_s16, %s829_s16   ;;  %s598_s15 = sphi %s638_s15, %s828_s15  }
   0xa   : > { %s663_s21 = sadd.s32 1, %s610_s18   ;;  %s30_s22 = sadd.s32 1, %s606_s17 }
   0xb   : > { %s27_s23 = ssub.s32 %s610_s18, %s663_s21  ;;  %p37_p0 = scmp.ne.s32.totalorder %s606_s17, %s602_s16 }
   0xc   : > { %p28_p1 = scmp.eq.s32.totalorder %s27_s23, 0  ;;  %p38_p2 = scmp.eq.s32.totalorder %s610_s18, 0 }
   0xd   : > { %p43_p3 = scmp.ne.s32.totalorder %s602_s16, %s598_s15  ;;  %p44_p4 = scmp.eq.s32.totalorder %s659_s19, 0 }
   0xe   : > { %s675_s24 = scalar_select %p28_p1, %s606_s17, %s30_s22  }
   0xf   : > { %p677_p5 = por %p38_p2, %p37_p0  ;;  %p681_p6 = por %p44_p4, %p43_p3 }
  0x10   : > { %p135_p7 = scmp.eq.s32.totalorder %s659_s19, 1  ;;  %p141_p8 = scmp.eq.s32.totalorder %s407_s20, 1 }
  0x11   : > { %p439_p10 = scmp.lt.s32.totalorder %s610_s18, 2  ;;  %s697_s29 = sand.u32 1, %s606_s17  }
  0x12   : > { %p688_p11 = por %p135_p7, %p37_p0  ;;  %p692_p12 = por %p141_p8, %p43_p3 }
  0x13   : > { %s411_s30 = sshll.u32 %s610_s18, 3  ;;  %s410_s5 = sshll.u32 %s697_s29, 3 }
  0x14   : > { %s824_s0 = sld [smem:[#allocation11_spill]]  ;;  %s171_s10 = scalar_lea.vmem [#allocation2], %s410_s5 }
  0x15   : > { %s179_s11 = sshll.u32 %s171_s10, 4  ;;  %p706_p13 = pnand %p439_p10, %p677_p5  ;;  %s180_s11 = int_to_ptr.vmem [resolvable:$true] %s179_s11 }
  0x16   : > { %p414_p0 = scmp.ge.s32.totalorder %s610_s18, 1  ;;  %p203_p1 = scmp.lt.s32.totalorder %s610_s18, 3 }
  0x17   : > { %s168_s13 = scalar_lea.sflag [#allocation3], %s697_s29  ;;  %p484_p3 = pneg %p706_p13 }
  0x1a   : > { %s175_s8 = scalar_lea.hbm %s824_s0, %s411_s30  ;;  %s487_s25 = scalar_lea.hbm %s824_s0, 16 }
  0x1b   : > { %s177_s9 = sshll.u32 %s175_s8, 4  ;;  %s178_s9 = int_to_ptr.hbm [resolvable:$true] %s177_s9 }
  0x1c   : > { %s480_s14 = sshra.s32 %s178_s9, 4  ;;  %s481_s14 = int_to_ptr.hbm [resolvable:$true] %s480_s14 }
  0x1d   : > { %s482_s20 = scalar_lea.hbm %s481_s14, 8  ;;  %p488_p5 = scmp.lt.s32.totalorder %s481_s14, %s824_s0 }
  0x1e   : > { %p483_p2 = scmp.ne.s32.totalorder %s481_s14, %s482_s20  ;;  %p489_p8 = scmp.lt.s32.totalorder %s487_s25, %s482_s20 }
  0x20   : > { %p485_p4 = pnand %p484_p3, %p483_p2  ;;  %p490_p10 = por %p489_p8, %p488_p5 }
  0x22   : > { %p486_p7 = pneg %p485_p4 }
  0x24   : > { %p491_p9 = pnand %p490_p10, %p486_p7 }
  0x26   : > { %494 = shalt.err (!%p491_p9)
}
  0x27   : > { %431 = dma.hbm_to_vmem [thread:$0]  (!%p706_p13), %s178_s9, 128, %s180_s11, %s168_s13  }
  0x28   : > { %p730_p2 = pnand %p414_p0, %p203_p1  ;;  %s194_s14 = scalar_lea.hbm %s815_s1, %s411_s30 }
  0x29   : > { %s196_s20 = sshll.u32 %s194_s14, 4  ;;  %s190_s23 = scalar_lea.vmem [#allocation5], %s410_s5  ;;  %s197_s20 = int_to_ptr.hbm [resolvable:$true] %s196_s20 }
  0x2a   : > { %s198_s25 = sshll.u32 %s190_s23, 4  ;;  %s187_s6 = scalar_lea.sflag [#allocation6], %s697_s29  ;;  %s199_s25 = int_to_ptr.vmem [resolvable:$true] %s198_s25 }
  0x2b   : > { %s510_s7 = sshra.s32 %s197_s20, 4  ;;  %s517_s13 = scalar_lea.hbm %s815_s1, 16  ;;  %s511_s7 = int_to_ptr.hbm [resolvable:$true] %s510_s7 }
  0x2c   : > { %s512_s0 = scalar_lea.hbm %s511_s7, 8  ;;  %p518_p4 = scmp.lt.s32.totalorder %s511_s7, %s815_s1 }
  0x2d   : > { %p513_p9 = scmp.ne.s32.totalorder %s511_s7, %s512_s0  ;;  %p519_p7 = scmp.lt.s32.totalorder %s517_s13, %s512_s0 }
  0x2f   : > { %p515_p0 = pnand %p513_p9, %p484_p3  ;;  %p520_p5 = por %p519_p7, %p518_p4 }
  0x31   : > { %p516_p1 = pneg %p515_p0 }
  0x33   : > { %p521_p8 = pnand %p520_p5, %p516_p1 }
  0x35   : > { %524 = shalt.err (!%p521_p8)
}
  0x36   : > { %434 = dma.hbm_to_vmem [thread:$0]  (!%p706_p13), %s197_s20, 128, %s199_s25, %s187_s6  }
  0x37   : > { %207 = sbr.rel (%p730_p2) target bundleno = 337 (0x151), region = 36  ;;  %s752_s29 = sand.u32 (!%p730_p2), 1, %s602_s16  }
  0x38   : > { %s755_s5 = sshll.u32 (!%p730_p2), %s752_s29, 3  ;;  %s210_s22 = scalar_lea.sflag (!%p730_p2), [#allocation3], %s752_s29 }
  0x39   : > { %s213_s0 = scalar_lea.vmem (!%p730_p2), [#allocation2], %s755_s5 }
  0x3c   : > { %585 = dma.done.wait (%p681_p6), %s210_s22, 128  }
  0x3d   : > { %587 = vsyncadd (%p681_p6), %s210_s22, 4294967168  ;;  %s220_s12 = scalar_lea.sflag [#allocation6], %s752_s29  ;;  %s223_s8 = scalar_lea.vmem [#allocation5], %s755_s5 }
  0x3e   : > { %589 = dma.done.wait (%p681_p6), %s220_s12, 128  }
  0x3f   : > { %591 = vsyncadd (%p681_p6), %s220_s12, 4294967168  ;;  %vm255_vm0 = vcmask 261120   ;;  %v254_v0 = vld [vmem:[%s213_s0] sm:$0xff]  ;;  %v612_v2 = vmov 32.0   ;;  %s419_s26 = sshll.u32 %s659_s19, 3  ;;  %v295_v28 = vld [vmem:[%s223_s8] sm:$0xff] }
  0x40   : > { %v256_v1 = vsel %vm255_vm0, %v254_v0, 0.0  ;;  %476 = vrcp.f32 %v612_v2  ;;  %v474_v23 = vld [vmem:[%s816_s2] ss:$0 sm:$0xff]  ;;  %s309_s9 = scalar_lea.hbm %s818_s4, %s419_s26  ;;  %s253_s19 = scalar_lea.vmem [#allocation7], %s755_s5 }
  0x41   : > { %257 = vadd.xlane.f32.xlu0 %v256_v1  ;;  %v475_v25 = vld [vmem:[%s817_s3] ss:$0 sm:$0xff]  ;;  %s311_s11 = sshll.u32 %s253_s19, 4  ;;  %s313_s13 = sshll.u32 %s309_s9, 4  ;;  %s312_s11 = int_to_ptr.vmem [resolvable:$true] %s311_s11  ;;  %s314_s13 = int_to_ptr.hbm [resolvable:$true] %s313_s13 }
  0x42   : > { %s299_s10 = scalar_lea.sflag [#allocation4], %s752_s29  ;;  %s554_s30 = sshra.s32 %s314_s13, 4  ;;  %s555_s30 = int_to_ptr.hbm [resolvable:$true] %s554_s30 }
  0x43   : > { %s556_s22 = scalar_lea.hbm %s555_s30, 8  ;;  %s560_s5 = scalar_lea.hbm %s818_s4, 16 }
  0x44   : > { %p557_p6 = scmp.ne.s32.totalorder %s555_s30, %s556_s22  ;;  %p561_p10 = scmp.lt.s32.totalorder %s555_s30, %s818_s4 }
  0x45   : > { %p562_p2 = scmp.lt.s32.totalorder %s560_s5, %s556_s22 }
  0x46   : > { %v477_v3 = vpop.eup %476  ;;  %p558_p13 = pnand %p557_p6, %p688_p11 }
  0x47   : > { %v260_v4 = vmul.f32 32.0, %v477_v3  ;;  %vm264_vm1 = vweird.f32 %v477_v3  ;;  %p563_p9 = por %p562_p2, %p561_p10 }
  0x48   : > { %p559_p3 = pneg %p558_p13 }
  0x49   : > { %v261_v5 = vsub.f32 1.0, %v260_v4 }
  0x4a   : > { %p564_p0 = pnand %p563_p9, %p559_p3 }
  0x4b   : > { %v262_v6 = vmul.f32 %v477_v3, %v261_v5 }
  0x4d   : > { %v263_v7 = vadd.f32 %v477_v3, %v262_v6 }
  0x4f   : > { %v265_v8 = vsel %vm264_vm1, %v477_v3, %v263_v7 }
  0xb4   : > { %v258_v9 = vpop.xlane.xlu0 %257 }
  0xb5   : > { %v266_v10 = vmul.f32 %v265_v8, %v258_v9 }
  0xb7   : > { %v267_v11 = vsub.f32 %v254_v0, %v266_v10 }
  0xb9   : > { %v268_v12 = vmul.f32 %v267_v11, %v267_v11 }
  0xbb   : > { %v269_v13 = vsel %vm255_vm0, %v268_v12, 0.0 }
  0xbc   : > { %270 = vadd.xlane.f32.xlu0 %v269_v13 }
 0x12f   : > { %v271_v14 = vpop.xlane.xlu0 %270 }
 0x130   : > { %v272_v15 = vmul.f32 %v271_v14, %v265_v8 }
 0x132   : > { %v273_v16 = vadd.f32 1e-05, %v272_v15 }
 0x134   : > { %478 = vrsqrt.f32 %v273_v16  ;;  %vm280_vm3 = vweird.f32 %v273_v16 }
 0x13a   : > { %v479_v17 = vpop.eup %478 }
 0x13b   : > { %v275_v18 = vmul.f32 %v479_v17, %v273_v16  ;;  %vm281_vm2 = vweird.f32 %v479_v17 }
 0x13c   : > { %vm282_vm4 = vmor %vm280_vm3, %vm281_vm2 }
 0x13d   : > { %v276_v19 = vmul.f32 %v479_v17, %v275_v18 }
 0x13f   : > { %v277_v20 = vmul.f32 0.5, %v276_v19 }
 0x141   : > { %v278_v21 = vsub.f32 1.5, %v277_v20 }
 0x143   : > { %v279_v22 = vmul.f32 %v479_v17, %v278_v21 }
 0x145   : > { %v283_v24 = vsel %vm282_vm4, %v479_v17, %v279_v22 }
 0x146   : > { %v284_v26 = vmul.f32 %v283_v24, %v267_v11 }
 0x148   : > { %v289_v27 = vmul.f32 %v474_v23, %v284_v26 }
 0x14a   : > { %v294_v29 = vadd.f32 %v475_v25, %v289_v27 }
 0x14c   : > { %v296_v30 = vadd.f32 %v295_v28, %v294_v29 }
 0x14e   : > { %297 = vst.msk [vmem:[%s253_s19] sm:$0xff] %vm255_vm0, %v296_v30 }
 0x14f   : > { %567 = shalt.err (!%p564_p0)
}
 0x150   : > { %426 = dma.vmem_to_hbm [thread:$0]  (%p688_p11), %s312_s11, 128, %s314_s13, %s299_s10  }
 0x151 PF: > { %s325_s29 = sand.u32 1, %s598_s15   ;;  %p827_p1 = scmp.ge.s32.totalorder %s610_s18, 2 }
 0x152   : > { %s326_s14 = scalar_lea.sflag [#allocation4], %s325_s29 }
 0x153   : > { %p436_p4 = pnand %p827_p1, %p692_p12 }
 0x155   : > { %p437_p7 = pneg %p436_p4 }
 0x157   : > { %593 = dma.done.wait (%p437_p7), %s326_s14, 128  }
 0x158   : > { %595 = vsyncadd (%p437_p7), %s326_s14, 4294967168  ;;  %p20_p5 = scmp.ge.s32.totalorder %s663_s21, 4   ;;  %s828_s15 = smov %s602_s16 }
 0x159   : > { %s829_s16 = smov %s606_s17  ;;  %s830_s17 = smov %s675_s24 }
 0x15a   : > { %s831_s18 = smov %s663_s21  ;;  %22 = sbr.rel (!%p20_p5) target bundleno = 9 (0x9), region = 94 }
 0x15f   :  { %332 = vsyncpa [#allocation3], 1 }
 0x160   :  { %334 = vsyncpa [#allocation3 + $0x1], 1 }
 0x161   :  { %335 = vsyncpa [#allocation6], 1 }
 0x162   :  { %337 = vsyncpa [#allocation6 + $0x1], 1 }
 0x163   :  { %338 = vsyncpa [#allocation4], 1 }
 0x164   :  { %340 = vsyncpa [#allocation4 + $0x1], 1 }

</bundles_post_ra>
